<compile_context>
chip_gen: v7x
topology: tpu7x:2x2x1
jax: 0.10.0
libtpu: 0.0.40
codegen_flags: <defaults>
</compile_context>

<pallas_src>
import jax
import jax.numpy as jnp
from jax.experimental import pallas as pl
from jax.experimental.pallas import tpu as pltpu

CRITIC_FCS1_UNITS = 300
CRITIC_FC2_UNITS = 200
CRITIC_FC3_UNITS = 100
BN_EPS = 1e-5
_LANE = 128


def _pad_to_lane(n, m=_LANE):
    return ((n + m - 1) // m) * m


def _critic_kernel(xs_ref, w1_ref, w2_ref, w3_ref, p_ref, out_ref):
    """Whole forward pass in one VMEM-resident kernel (shapes are tiny)."""
    f32 = jnp.float32
    bf16 = jnp.bfloat16

    f2p = w2_ref.shape[1]
    f3p = w3_ref.shape[1]

    xs = xs_ref[...]                                   # (B, Din_pad) f32
    inv_b = 1.0 / xs.shape[0]

    p = p_ref[...]                                     # (8, F1_pad) f32, packed
    b1, g1, beta1 = p[0:1, :], p[1:2, :], p[2:3, :]
    b2, g2, beta2 = p[3:4, :f2p], p[4:5, :f2p], p[5:6, :f2p]
    b3 = p[6:7, :f3p]
    b4 = p[6:7, f3p:f3p + 1]
    w4_row = p[7:8, :f3p]

    def bn(h, g, beta):
        # Training-mode BatchNorm1d: per-batch mean, biased variance (two-pass).
        m = jnp.sum(h, axis=0, keepdims=True) * inv_b
        c = h - m
        v = jnp.sum(c * c, axis=0, keepdims=True) * inv_b
        return c * (g * jax.lax.rsqrt(v + BN_EPS)) + beta

    # ---- fcs1 + relu + bn1  (state|action folded into one bf16 MXU pass) ----
    h1 = jnp.dot(xs.astype(bf16), w1_ref[...], preferred_element_type=f32) + b1
    h1 = bn(jnp.maximum(h1, 0.0), g1, beta1)

    # ---- fc2 + relu + bn2 ----
    h2 = jnp.dot(h1.astype(bf16), w2_ref[...], preferred_element_type=f32) + b2
    h2 = bn(jnp.maximum(h2, 0.0), g2, beta2)

    # ---- fc3 + relu ----
    h3 = jnp.dot(h2.astype(bf16), w3_ref[...], preferred_element_type=f32) + b3
    h3 = jnp.maximum(h3, 0.0)

    # ---- fc4 head: N=1 matmul replaced by VPU multiply + lane reduction ----
    q = jnp.sum(h3 * w4_row, axis=-1, keepdims=True) + b4
    out_ref[...] = q.astype(out_ref.dtype)


@jax.jit
def critic_forward(state, action, params):
    """state: (B, input_dim), action: (B, action_size) -> (B, 1) f32."""
    if state.ndim == 1:
        state = state[None, :]
    if action.ndim == 1:
        action = action[None, :]

    B = state.shape[0]
    d_in_pad = params["w1"].shape[0]

    # Concat + lane-pad the tiny (B, 26) input in the wrapper (~1 KB, negligible);
    # gives one unmasked DMA and a single MXU pass for layer 1.
    xs = jnp.concatenate([state.astype(jnp.float32), action.astype(jnp.float32)],
                         axis=1)
    xs = jnp.pad(xs, ((0, 0), (0, d_in_pad - xs.shape[1])))

    vmem = pl.BlockSpec(memory_space=pltpu.MemorySpace.VMEM)
    args = (xs, params["w1"], params["w2"], params["w3"], params["packed"])
    return pl.pallas_call(
        _critic_kernel,
        out_shape=jax.ShapeDtypeStruct((B, 1), jnp.float32),
        in_specs=[vmem] * len(args),
        out_specs=vmem,
    )(*args)


def init_params(key, input_dim, action_size,
                fcs1=CRITIC_FCS1_UNITS, fc2=CRITIC_FC2_UNITS, fc3=CRITIC_FC3_UNITS):
    """Init mirroring Critic.reset_parameters(); lane-padded, bf16 weights.

    Weights are (in_features, out_features), zero-padded; gamma of padded
    columns is 0 so padded lanes stay exactly 0 through BN.  Small per-layer
    vectors are packed into one (8, F1_pad) f32 array:
      row0 b1 | row1 g1 | row2 beta1 | row3 b2 | row4 g2 | row5 beta2
      row6 [b3 (0:128), b4 (128)] | row7 w4 row (0:128)
    """
    ks = jax.random.split(key, 8)
    d_in = input_dim + action_size
    d_in_pad = _pad_to_lane(d_in)
    f1p, f2p, f3p = _pad_to_lane(fcs1), _pad_to_lane(fc2), _pad_to_lane(fc3)

    def uni(k, shape, lim):
        return jax.random.uniform(k, shape, jnp.float32, minval=-lim, maxval=lim)

    def pad2(x, rows, cols):
        return jnp.pad(x, ((0, rows - x.shape[0]), (0, cols - x.shape[1])))

    # hidden_init uses weight.size()[0] == out_features in PyTorch (as written);
    # Linear bias default init uses 1/sqrt(in_features).
    w1 = uni(ks[0], (d_in, fcs1), fcs1 ** -0.5)
    b1 = uni(ks[1], (1, fcs1), d_in ** -0.5)
    w2 = uni(ks[2], (fcs1, fc2), fc2 ** -0.5)
    b2 = uni(ks[3], (1, fc2), fcs1 ** -0.5)
    w3 = uni(ks[4], (fc2, fc3), fc3 ** -0.5)
    b3 = uni(ks[5], (1, fc3), fc2 ** -0.5)
    w4 = uni(ks[6], (fc3, 1), 3e-3)
    b4 = uni(ks[7], (1, 1), fc3 ** -0.5)

    def mask(n_real, n_pad):
        return (jnp.arange(n_pad) < n_real).astype(jnp.float32)[None, :]

    def row(vec):
        return jnp.pad(vec, ((0, 0), (0, f1p - vec.shape[1])))

    row6 = jnp.concatenate([pad2(b3, 1, f3p), b4], axis=1)          # b3 | b4
    packed = jnp.concatenate([
        row(pad2(b1, 1, f1p)),                 # b1
        row(mask(fcs1, f1p)),                  # g1 (ones on real cols, 0 on pads)
        jnp.zeros((1, f1p), jnp.float32),      # beta1
        row(pad2(b2, 1, f2p)),                 # b2
        row(mask(fc2, f2p)),                   # g2
        jnp.zeros((1, f1p), jnp.float32),      # beta2
        row(row6),                             # b3 | b4
        row(pad2(w4.T, 1, f3p)),               # w4 row
    ], axis=0)

    return {
        "w1": pad2(w1, d_in_pad, f1p).astype(jnp.bfloat16),
        "w2": pad2(w2, f1p, f2p).astype(jnp.bfloat16),
        "w3": pad2(w3, f2p, f3p).astype(jnp.bfloat16),
        "packed": packed,
    }


def _reference_forward(state, action, params):
    """Pure-JAX reference (PyTorch training-mode BN semantics, same bf16 MXU
    operand quantization as the kernel) on the same padded params."""
    f32, bf16 = jnp.float32, jnp.bfloat16
    d_in_pad = params["w1"].shape[0]
    f2p = params["w2"].shape[1]
    f3p = params["w3"].shape[1]

    xs = jnp.concatenate([state.astype(f32), action.astype(f32)], axis=1)
    xs = jnp.pad(xs, ((0, 0), (0, d_in_pad - xs.shape[1])))

    p = params["packed"]
    b1, g1, beta1 = p[0:1, :], p[1:2, :], p[2:3, :]
    b2, g2, beta2 = p[3:4, :f2p], p[4:5, :f2p], p[5:6, :f2p]
    b3, b4 = p[6:7, :f3p], p[6:7, f3p:f3p + 1]
    w4_row = p[7:8, :f3p]

    def bn(x, g, b):
        m = jnp.mean(x, axis=0, keepdims=True)
        v = jnp.mean((x - m) ** 2, axis=0, keepdims=True)
        return (x - m) * jax.lax.rsqrt(v + BN_EPS) * g + b

    h1 = jnp.maximum(
        jnp.dot(xs.astype(bf16), params["w1"], preferred_element_type=f32) + b1, 0.0)
    h1 = bn(h1, g1, beta1)
    h2 = jnp.maximum(
        jnp.dot(h1.astype(bf16), params["w2"], preferred_element_type=f32) + b2, 0.0)
    h2 = bn(h2, g2, beta2)
    h3 = jnp.maximum(
        jnp.dot(h2.astype(bf16), params["w3"], preferred_element_type=f32) + b3, 0.0)
    return jnp.sum(h3 * w4_row, axis=-1, keepdims=True) + b4


if __name__ == "__main__":
    # Tennis env: state dim 24 per agent, action dim 2; small batch of 8.
    B, INPUT_DIM, ACTION_SIZE = 8, 24, 2

    key = jax.random.PRNGKey(0)
    k_state, k_action, k_params = jax.random.split(key, 3)

    state = jax.random.normal(k_state, (B, INPUT_DIM), jnp.float32)
    action = jax.random.uniform(k_action, (B, ACTION_SIZE), jnp.float32,
                                minval=-1.0, maxval=1.0)
    params = init_params(k_params, INPUT_DIM, ACTION_SIZE)

    q = critic_forward(state, action, params)
    q = jax.block_until_ready(q)

    q_ref = _reference_forward(state, action, params)
    assert q.shape == (B, 1)
    assert jnp.allclose(q, q_ref, atol=2e-3, rtol=2e-3), "mismatch vs reference"

    print("KERNEL_OK")
</pallas_src>

<mosaic_0001>
module attributes {stable_mosaic.version = 11 : i64} {
  func.func @_critic_kernel(%arg0: memref<8x128xf32, #tpu.memory_space<vmem>>, %arg1: memref<128x384xbf16, #tpu.memory_space<vmem>>, %arg2: memref<384x256xbf16, #tpu.memory_space<vmem>>, %arg3: memref<256x128xbf16, #tpu.memory_space<vmem>>, %arg4: memref<8x384xf32, #tpu.memory_space<vmem>>, %arg5: memref<8x1xf32, #tpu.memory_space<vmem>>) attributes {dimension_semantics = [], scalar_prefetch = 0 : i64, scratch_operands = 0 : i64, tpu.core_type = #tpu.core_type<tc>} {
    %c0 = arith.constant 0 : index
    %c0_0 = arith.constant 0 : index
    %0 = vector.load %arg0[%c0, %c0_0] : memref<8x128xf32, #tpu.memory_space<vmem>>, vector<8x128xf32>
    %c0_1 = arith.constant 0 : index
    %c0_2 = arith.constant 0 : index
    %1 = vector.load %arg4[%c0_1, %c0_2] : memref<8x384xf32, #tpu.memory_space<vmem>>, vector<8x384xf32>
    %2 = vector.extract_strided_slice %1 {offsets = [0, 0], sizes = [1, 384], strides = [1, 1]} : vector<8x384xf32> to vector<1x384xf32>
    %3 = vector.extract_strided_slice %1 {offsets = [1, 0], sizes = [1, 384], strides = [1, 1]} : vector<8x384xf32> to vector<1x384xf32>
    %4 = vector.extract_strided_slice %1 {offsets = [2, 0], sizes = [1, 384], strides = [1, 1]} : vector<8x384xf32> to vector<1x384xf32>
    %5 = vector.extract_strided_slice %1 {offsets = [3, 0], sizes = [1, 256], strides = [1, 1]} : vector<8x384xf32> to vector<1x256xf32>
    %6 = vector.extract_strided_slice %1 {offsets = [4, 0], sizes = [1, 256], strides = [1, 1]} : vector<8x384xf32> to vector<1x256xf32>
    %7 = vector.extract_strided_slice %1 {offsets = [5, 0], sizes = [1, 256], strides = [1, 1]} : vector<8x384xf32> to vector<1x256xf32>
    %8 = vector.extract_strided_slice %1 {offsets = [6, 0], sizes = [1, 128], strides = [1, 1]} : vector<8x384xf32> to vector<1x128xf32>
    %9 = vector.extract_strided_slice %1 {offsets = [6, 128], sizes = [1, 1], strides = [1, 1]} : vector<8x384xf32> to vector<1x1xf32>
    %10 = vector.extract_strided_slice %1 {offsets = [7, 0], sizes = [1, 128], strides = [1, 1]} : vector<8x384xf32> to vector<1x128xf32>
    %11 = arith.truncf %0 : vector<8x128xf32> to vector<8x128xbf16>
    %c0_3 = arith.constant 0 : index
    %c0_4 = arith.constant 0 : index
    %12 = vector.load %arg1[%c0_3, %c0_4] : memref<128x384xbf16, #tpu.memory_space<vmem>>, vector<128x384xbf16>
    %cst = arith.constant dense<0.000000e+00> : vector<8x384xf32>
    %13 = tpu.matmul %11, %12, %cst {dimension_numbers = #tpu.dot_dimension_numbers<[1], [0], [0], [1], [0, 0, 1, 1], [], []>} : vector<8x128xbf16>, vector<128x384xbf16>, vector<8x384xf32> -> vector<8x384xf32>
    %14 = vector.broadcast %2 : vector<1x384xf32> to vector<8x384xf32>
    %15 = arith.addf %13, %14 : vector<8x384xf32>
    %cst_5 = arith.constant 0.000000e+00 : f32
    %16 = vector.broadcast %cst_5 : f32 to vector<8x384xf32>
    %17 = arith.maximumf %15, %16 : vector<8x384xf32>
    %cst_6 = arith.constant dense<0.000000e+00> : vector<384xf32>
    %18 = vector.multi_reduction <add>, %17, %cst_6 [0] : vector<8x384xf32> to vector<384xf32>
    %19 = vector.shape_cast %18 : vector<384xf32> to vector<1x384xf32>
    %cst_7 = arith.constant 1.250000e-01 : f32
    %20 = vector.broadcast %cst_7 : f32 to vector<1x384xf32>
    %21 = arith.mulf %19, %20 : vector<1x384xf32>
    %22 = vector.broadcast %21 : vector<1x384xf32> to vector<8x384xf32>
    %23 = arith.subf %17, %22 : vector<8x384xf32>
    %24 = arith.mulf %23, %23 : vector<8x384xf32>
    %cst_8 = arith.constant dense<0.000000e+00> : vector<384xf32>
    %25 = vector.multi_reduction <add>, %24, %cst_8 [0] : vector<8x384xf32> to vector<384xf32>
    %26 = vector.shape_cast %25 : vector<384xf32> to vector<1x384xf32>
    %cst_9 = arith.constant 1.250000e-01 : f32
    %27 = vector.broadcast %cst_9 : f32 to vector<1x384xf32>
    %28 = arith.mulf %26, %27 : vector<1x384xf32>
    %cst_10 = arith.constant 9.99999974E-6 : f32
    %29 = vector.broadcast %cst_10 : f32 to vector<1x384xf32>
    %30 = arith.addf %28, %29 : vector<1x384xf32>
    %31 = math.rsqrt %30 : vector<1x384xf32>
    %32 = arith.mulf %3, %31 : vector<1x384xf32>
    %33 = vector.broadcast %32 : vector<1x384xf32> to vector<8x384xf32>
    %34 = arith.mulf %23, %33 : vector<8x384xf32>
    %35 = vector.broadcast %4 : vector<1x384xf32> to vector<8x384xf32>
    %36 = arith.addf %34, %35 : vector<8x384xf32>
    %37 = arith.truncf %36 : vector<8x384xf32> to vector<8x384xbf16>
    %c0_11 = arith.constant 0 : index
    %c0_12 = arith.constant 0 : index
    %38 = vector.load %arg2[%c0_11, %c0_12] : memref<384x256xbf16, #tpu.memory_space<vmem>>, vector<384x256xbf16>
    %cst_13 = arith.constant dense<0.000000e+00> : vector<8x256xf32>
    %39 = tpu.matmul %37, %38, %cst_13 {dimension_numbers = #tpu.dot_dimension_numbers<[1], [0], [0], [1], [0, 0, 1, 1], [], []>} : vector<8x384xbf16>, vector<384x256xbf16>, vector<8x256xf32> -> vector<8x256xf32>
    %40 = vector.broadcast %5 : vector<1x256xf32> to vector<8x256xf32>
    %41 = arith.addf %39, %40 : vector<8x256xf32>
    %cst_14 = arith.constant 0.000000e+00 : f32
    %42 = vector.broadcast %cst_14 : f32 to vector<8x256xf32>
    %43 = arith.maximumf %41, %42 : vector<8x256xf32>
    %cst_15 = arith.constant dense<0.000000e+00> : vector<256xf32>
    %44 = vector.multi_reduction <add>, %43, %cst_15 [0] : vector<8x256xf32> to vector<256xf32>
    %45 = vector.shape_cast %44 : vector<256xf32> to vector<1x256xf32>
    %cst_16 = arith.constant 1.250000e-01 : f32
    %46 = vector.broadcast %cst_16 : f32 to vector<1x256xf32>
    %47 = arith.mulf %45, %46 : vector<1x256xf32>
    %48 = vector.broadcast %47 : vector<1x256xf32> to vector<8x256xf32>
    %49 = arith.subf %43, %48 : vector<8x256xf32>
    %50 = arith.mulf %49, %49 : vector<8x256xf32>
    %cst_17 = arith.constant dense<0.000000e+00> : vector<256xf32>
    %51 = vector.multi_reduction <add>, %50, %cst_17 [0] : vector<8x256xf32> to vector<256xf32>
    %52 = vector.shape_cast %51 : vector<256xf32> to vector<1x256xf32>
    %cst_18 = arith.constant 1.250000e-01 : f32
    %53 = vector.broadcast %cst_18 : f32 to vector<1x256xf32>
    %54 = arith.mulf %52, %53 : vector<1x256xf32>
    %cst_19 = arith.constant 9.99999974E-6 : f32
    %55 = vector.broadcast %cst_19 : f32 to vector<1x256xf32>
    %56 = arith.addf %54, %55 : vector<1x256xf32>
    %57 = math.rsqrt %56 : vector<1x256xf32>
    %58 = arith.mulf %6, %57 : vector<1x256xf32>
    %59 = vector.broadcast %58 : vector<1x256xf32> to vector<8x256xf32>
    %60 = arith.mulf %49, %59 : vector<8x256xf32>
    %61 = vector.broadcast %7 : vector<1x256xf32> to vector<8x256xf32>
    %62 = arith.addf %60, %61 : vector<8x256xf32>
    %63 = arith.truncf %62 : vector<8x256xf32> to vector<8x256xbf16>
    %c0_20 = arith.constant 0 : index
    %c0_21 = arith.constant 0 : index
    %64 = vector.load %arg3[%c0_20, %c0_21] : memref<256x128xbf16, #tpu.memory_space<vmem>>, vector<256x128xbf16>
    %cst_22 = arith.constant dense<0.000000e+00> : vector<8x128xf32>
    %65 = tpu.matmul %63, %64, %cst_22 {dimension_numbers = #tpu.dot_dimension_numbers<[1], [0], [0], [1], [0, 0, 1, 1], [], []>} : vector<8x256xbf16>, vector<256x128xbf16>, vector<8x128xf32> -> vector<8x128xf32>
    %66 = vector.broadcast %8 : vector<1x128xf32> to vector<8x128xf32>
    %67 = arith.addf %65, %66 : vector<8x128xf32>
    %cst_23 = arith.constant 0.000000e+00 : f32
    %68 = vector.broadcast %cst_23 : f32 to vector<8x128xf32>
    %69 = arith.maximumf %67, %68 : vector<8x128xf32>
    %70 = vector.broadcast %10 : vector<1x128xf32> to vector<8x128xf32>
    %71 = arith.mulf %69, %70 : vector<8x128xf32>
    %cst_24 = arith.constant dense<0.000000e+00> : vector<8xf32>
    %72 = vector.multi_reduction <add>, %71, %cst_24 [1] : vector<8x128xf32> to vector<8xf32>
    %73 = vector.shape_cast %72 : vector<8xf32> to vector<8x1xf32>
    %74 = vector.broadcast %9 : vector<1x1xf32> to vector<8x1xf32>
    %75 = arith.addf %73, %74 : vector<8x1xf32>
    %c0_25 = arith.constant 0 : index
    %c0_26 = arith.constant 0 : index
    %76 = vector.load %arg5[%c0_25, %c0_26] : memref<8x1xf32, #tpu.memory_space<vmem>>, vector<8x1xf32>
    tpu.vector_store %arg5[%c0_25, %c0_26], %75 {strides = array<i32>} : memref<8x1xf32, #tpu.memory_space<vmem>>, vector<8x1xf32>,
    return
  }
}

</mosaic_0001>

<bundles_post_ra>
// kernel: critic_forward.1
= control target key start
LH: loop header
LB: loop body
LE: loop exit
PB: predicated region body
PF: predicated region fallthrough
CT: control target
= control target key end

     0   :  { %10 = vsyncpa [#allocation3], 0  ;;  %s1537_s0 = inlined_call_operand.vmem [shape: f32[8,128], index: 0, kind: input, shape index: {}]   ;;  %s1538_s1 = inlined_call_operand.hbm [shape: bf16[128,384], index: 1, kind: input, shape index: {}]   ;;  %s1539_s2 = inlined_call_operand.hbm [shape: bf16[384,256], index: 2, kind: input, shape index: {}]   ;;  %s1540_s3 = inlined_call_operand.hbm [shape: bf16[256,128], index: 3, kind: input, shape index: {}]   ;;  %s1541_s4 = inlined_call_operand.vmem [shape: f32[8,384], index: 4, kind: input, shape index: {}]   ;;  %s1542_s5 = inlined_call_operand.vmem [shape: f32[8,1], index: 5, kind: output, shape index: {}]  }
   0x1   :  { %11 = vsyncpa [#allocation5], 0  ;;  %s1403_s18 = smov [#allocation4]   ;;  %s1333_s22 = scalar_lea.hbm %s1539_s2, 6144 }
   0x2   :  { %s31_s19 = sshll.u32 %s1403_s18, 4  ;;  %p1334_p0 = scmp.ne.s32.totalorder %s1539_s2, %s1333_s22  ;;  %s32_s19 = int_to_ptr.vmem [resolvable:$true] %s31_s19 }
   0x3   :  { %p1337_p1 = scmp.lt.u32.totalorder %s1333_s22, %s1539_s2 }
   0x5   :  { %p1339_p2 = pnand %p1337_p1, %p1334_p0 }
   0x7   :  { %1342 = shalt.err (!%p1339_p2)
}
   0x8   :  { %s1343_s27 = scalar_lea.vmem %s32_s19, 6144  ;;  %p1348_p4 = scmp.lt.s32.totalorder %s32_s19, %s32_s19 }
   0x9   :  { %p1344_p3 = scmp.ne.s32.totalorder %s32_s19, %s1343_s27  ;;  %p1349_p5 = scmp.lt.s32.totalorder %s1343_s27, %s1343_s27 }
   0xb   :  { %p1350_p6 = por %p1349_p5, %p1348_p4 }
   0xd   :  { %p1351_p7 = pnand %p1350_p6, %p1344_p3 }
   0xf   :  { %1354 = shalt.err (!%p1351_p7)
}
  0x10   :  { %s1404_s28 = smov 128   ;;  %s1405_s29 = smov 8  }
  0x11   :  { %37 = dma.hbm_to_vmem [thread:$0]  %s1539_s2, 6144, %s32_s19, [#allocation5], %s1404_s28, %s1404_s28, %s1405_s29  }
  0x12   :  { %s1406_s7 = smov [#allocation2]   ;;  %s1355_s11 = scalar_lea.hbm %s1538_s1, 3072 }
  0x13   :  { %s19_s8 = sshll.u32 %s1406_s7, 4  ;;  %p1356_p8 = scmp.ne.s32.totalorder %s1538_s1, %s1355_s11  ;;  %s20_s8 = int_to_ptr.vmem [resolvable:$true] %s19_s8 }
  0x14   :  { %p1359_p9 = scmp.lt.u32.totalorder %s1355_s11, %s1538_s1 }
  0x16   :  { %p1361_p10 = pnand %p1359_p9, %p1356_p8 }
  0x18   :  { %1364 = shalt.err (!%p1361_p10)
}
  0x19   :  { %s1365_s16 = scalar_lea.vmem %s20_s8, 3072  ;;  %p1370_p12 = scmp.lt.s32.totalorder %s20_s8, %s20_s8 }
  0x1a   :  { %p1366_p11 = scmp.ne.s32.totalorder %s20_s8, %s1365_s16  ;;  %p1371_p13 = scmp.lt.s32.totalorder %s1365_s16, %s1365_s16 }
  0x1c   :  { %p1372_p0 = por %p1371_p13, %p1370_p12 }
  0x1e   :  { %p1373_p1 = pnand %p1372_p0, %p1366_p11 }
  0x20   :  { %1376 = shalt.err (!%p1373_p1)
}
  0x21   :  { %s1407_s2 = smov 192   ;;  %s1408_s17 = smov 12  }
  0x22   :  { %25 = dma.hbm_to_vmem [thread:$0]  %s1538_s1, 3072, %s20_s8, [#allocation3], %s1407_s2, %s1407_s2, %s1408_s17  }
  0x23   :  { %s1409_s20 = smov [#allocation6]   ;;  %s1377_s24 = scalar_lea.hbm %s1540_s3, 2048 }
  0x24   :  { %s43_s21 = sshll.u32 %s1409_s20, 4  ;;  %p1378_p2 = scmp.ne.s32.totalorder %s1540_s3, %s1377_s24  ;;  %s44_s21 = int_to_ptr.vmem [resolvable:$true] %s43_s21 }
  0x25   :  { %p1381_p3 = scmp.lt.u32.totalorder %s1377_s24, %s1540_s3 }
  0x27   :  { %p1383_p4 = pnand %p1381_p3, %p1378_p2 }
  0x29   :  { %1386 = shalt.err (!%p1383_p4)
}
  0x2a   :  { %s1387_s29 = scalar_lea.vmem %s44_s21, 2048  ;;  %p1392_p6 = scmp.lt.s32.totalorder %s44_s21, %s44_s21 }
  0x2b   :  { %p1388_p5 = scmp.ne.s32.totalorder %s44_s21, %s1387_s29  ;;  %p1393_p7 = scmp.lt.s32.totalorder %s1387_s29, %s1387_s29 }
  0x2d   :  { %p1394_p8 = por %p1393_p7, %p1392_p6 }
  0x2f   :  { %p1395_p9 = pnand %p1394_p8, %p1388_p5 }
  0x31   :  { %1398 = shalt.err (!%p1395_p9)
}
  0x32   :  { %s1410_s1 = smov 64   ;;  %s1411_s30 = smov 4  }
  0x33   :  { %49 = dma.hbm_to_vmem [thread:$0]  %s1540_s3, 2048, %s44_s21, [#allocation5], %s1410_s1, %s1410_s1, %s1411_s30  }
  0x34   :  { %1399 = dma.done.wait [#allocation3], 3072  }
  0x35   :  { %1400 = vsyncadd [#allocation3], 4294964224 }
  0x36   :  { %1401 = dma.done.wait [#allocation5], 8192  }
  0x37   :  { %1402 = vsyncadd [#allocation5], 4294959104  ;;  %v1412_v0 = vmov 0   ;;  %v1203_v1 = vld [vmem:[#allocation2 + $0x4] ss:$12 sps:$4 sm:$0xff]   ;;  %v1413_v22 = vmov 0.0   ;;  %v99_v61 = vlaneseq }
  0x38   :  { %271 = vmatprep.mubr.bf16.mxu1 %v1412_v0  ;;  %v1205_v2 = vld [vmem:[#allocation2] ss:$12 sps:$4 sm:$0xff]   ;;  %239 = vmatprep.subr.bf16.mxu1 %v1203_v1  ;;  %v1206_v3 = vld [vmem:[#allocation2 + $0x1c] ss:$12 sps:$4 sm:$0xff]   ;;  %v1208_v4 = vld [vmem:[#allocation2 + $0x18] ss:$12 sps:$4 sm:$0xff]  }
  0x39   :  { %240 = vmatpush1.bf16.msra.mxu1 %v1205_v2  ;;  %v1209_v5 = vld [vmem:[#allocation2 + $0x34] ss:$12 sps:$4 sm:$0xff]   ;;  %v1211_v6 = vld [vmem:[#allocation2 + $0x30] ss:$12 sps:$4 sm:$0xff]   ;;  %v1212_v7 = vld [vmem:[#allocation2 + $0x4c] ss:$12 sps:$4 sm:$0xff]  }
  0x3a   :  { %241 = vmatprep.subr.bf16.mxu1 %v1206_v3  ;;  %v1214_v8 = vld [vmem:[#allocation2 + $0x48] ss:$12 sps:$4 sm:$0xff]   ;;  %v1215_v9 = vld [vmem:[#allocation2 + $0x64] ss:$12 sps:$4 sm:$0xff]   ;;  %v1217_v10 = vld [vmem:[#allocation2 + $0x60] ss:$12 sps:$4 sm:$0xff]  }
  0x3b   :  { %v1218_v11 = vld [vmem:[#allocation2 + $0x7c] ss:$12 sps:$4 sm:$0xff]   ;;  %v1220_v12 = vld [vmem:[#allocation2 + $0x78] ss:$12 sps:$4 sm:$0xff]   ;;  %v1221_v14 = vld [vmem:[#allocation2 + $0x94] ss:$12 sps:$4 sm:$0xff]  }
  0x3c   :  { %v1235_v13 = vld [vmem:[#allocation4 + $0x4] ss:$8 sps:$4 sm:$0xff]   ;;  %v1237_v15 = vld [vmem:[#allocation4] ss:$8 sps:$4 sm:$0xff]   ;;  %v1223_v16 = vld [vmem:[#allocation2 + $0x90] ss:$12 sps:$4 sm:$0xff]  }
  0x3d   :  { %242 = vmatpush1.bf16.msra.mxu1 %v1208_v4  ;;  %709 = vmatprep.subr.bf16.mxu0 %v1235_v13  ;;  %v1224_v17 = vld [vmem:[#allocation2 + $0xac] ss:$12 sps:$4 sm:$0xff]   ;;  %v1226_v18 = vld [vmem:[#allocation2 + $0xa8] ss:$12 sps:$4 sm:$0xff]   ;;  %v62_v19 = vld [vmem:[%s1537_s0] sm:$0xff]  ;;  %vm1414_vm0 = vmmov 0  }
  0x3e   :  { %243 = vmatprep.subr.bf16.mxu1 %v1209_v5  ;;  %710 = vmatpush1.bf16.msra.mxu0 %v1237_v15  ;;  %v1227_v20 = vld [vmem:[#allocation2 + $0x8] ss:$12 sps:$4 sm:$0xff]   ;;  %v66_v21 = vpack.c.bf16 %v62_v19, %v62_v19  ;;  %v1228_v23 = vld [vmem:[#allocation2 + $0x20] ss:$12 sps:$4 sm:$0xff]   ;;  %v1229_v24 = vld [vmem:[#allocation2 + $0x38] ss:$12 sps:$4 sm:$0xff]  }
  0x3f   :  { %v1230_v25 = vld [vmem:[#allocation2 + $0x50] ss:$12 sps:$4 sm:$0xff]   ;;  %v1231_v26 = vld [vmem:[#allocation2 + $0x68] ss:$12 sps:$4 sm:$0xff]   ;;  %v1232_v27 = vld [vmem:[#allocation2 + $0x80] ss:$12 sps:$4 sm:$0xff]  }
  0x40   :  { %v1233_v28 = vld [vmem:[#allocation2 + $0x98] ss:$12 sps:$4 sm:$0xff]   ;;  %v1234_v29 = vld [vmem:[#allocation2 + $0xb0] ss:$12 sps:$4 sm:$0xff]   ;;  %v1243_v33 = vld [vmem:[#allocation4 + $0x20] ss:$8 sps:$4 sm:$0xff]  }
  0x41   :  { %244 = vmatpush1.bf16.msra.mxu1 %v1211_v6  ;;  %v1238_v30 = vld [vmem:[#allocation4 + $0x14] ss:$8 sps:$4 sm:$0xff]   ;;  %v1240_v31 = vld [vmem:[#allocation4 + $0x10] ss:$8 sps:$4 sm:$0xff]   ;;  %v1241_v32 = vld [vmem:[#allocation4 + $0x24] ss:$8 sps:$4 sm:$0xff]  }
  0x42   :  { %245 = vmatprep.subr.bf16.mxu1 %v1212_v7  ;;  %711 = vmatprep.subr.bf16.mxu0 %v1238_v30  ;;  %v1244_v34 = vld [vmem:[#allocation4 + $0x34] ss:$8 sps:$4 sm:$0xff]   ;;  %v1246_v35 = vld [vmem:[#allocation4 + $0x30] ss:$8 sps:$4 sm:$0xff]   ;;  %v1247_v36 = vld [vmem:[#allocation4 + $0x44] ss:$8 sps:$4 sm:$0xff]  }
  0x43   :  { %712 = vmatpush1.bf16.msra.mxu0 %v1240_v31  ;;  %v1249_v37 = vld [vmem:[#allocation4 + $0x40] ss:$8 sps:$4 sm:$0xff]   ;;  %v1250_v38 = vld [vmem:[#allocation4 + $0x54] ss:$8 sps:$4 sm:$0xff]   ;;  %v1252_v39 = vld [vmem:[#allocation4 + $0x50] ss:$8 sps:$4 sm:$0xff]  }
  0x44   :  { %713 = vmatprep.subr.bf16.mxu0 %v1241_v32  ;;  %v1253_v40 = vld [vmem:[#allocation4 + $0x64] ss:$8 sps:$4 sm:$0xff]   ;;  %v1255_v41 = vld [vmem:[#allocation4 + $0x60] ss:$8 sps:$4 sm:$0xff]   ;;  %v1256_v42 = vld [vmem:[#allocation4 + $0x74] ss:$8 sps:$4 sm:$0xff]  }
  0x45   :  { %246 = vmatpush1.bf16.msra.mxu1 %v1214_v8  ;;  %v1258_v43 = vld [vmem:[#allocation4 + $0x70] ss:$8 sps:$4 sm:$0xff]   ;;  %v1259_v44 = vld [vmem:[#allocation4 + $0x84] ss:$8 sps:$4 sm:$0xff]   ;;  %v1261_v45 = vld [vmem:[#allocation4 + $0x80] ss:$8 sps:$4 sm:$0xff]  }
  0x46   :  { %247 = vmatprep.subr.bf16.mxu1 %v1215_v9  ;;  %v1262_v46 = vld [vmem:[#allocation4 + $0x94] ss:$8 sps:$4 sm:$0xff]   ;;  %v1264_v47 = vld [vmem:[#allocation4 + $0x90] ss:$8 sps:$4 sm:$0xff]   ;;  %v1265_v48 = vld [vmem:[#allocation4 + $0xa4] ss:$8 sps:$4 sm:$0xff]  }
  0x47   :  { %714 = vmatpush1.bf16.msra.mxu0 %v1243_v33  ;;  %v1267_v49 = vld [vmem:[#allocation4 + $0xa0] ss:$8 sps:$4 sm:$0xff]   ;;  %v1268_v50 = vld [vmem:[#allocation4 + $0xb4] ss:$8 sps:$4 sm:$0xff]   ;;  %v1270_v51 = vld [vmem:[#allocation4 + $0xb0] ss:$8 sps:$4 sm:$0xff]  }
  0x48   :  { %715 = vmatprep.subr.bf16.mxu0 %v1244_v34  ;;  %v1271_v52 = vld [vmem:[#allocation4 + $0xc4] ss:$8 sps:$4 sm:$0xff]   ;;  %v1273_v53 = vld [vmem:[#allocation4 + $0xc0] ss:$8 sps:$4 sm:$0xff]   ;;  %v1274_v54 = vld [vmem:[#allocation4 + $0xd4] ss:$8 sps:$4 sm:$0xff]  }
  0x49   :  { %248 = vmatpush1.bf16.msra.mxu1 %v1217_v10  ;;  %v1276_v55 = vld [vmem:[#allocation4 + $0xd0] ss:$8 sps:$4 sm:$0xff]   ;;  %v1277_v56 = vld [vmem:[#allocation4 + $0xe4] ss:$8 sps:$4 sm:$0xff]   ;;  %v1279_v57 = vld [vmem:[#allocation4 + $0xe0] ss:$8 sps:$4 sm:$0xff]  }
  0x4a   :  { %249 = vmatprep.subr.bf16.mxu1 %v1218_v11  ;;  %v1280_v58 = vld [vmem:[#allocation4 + $0xf4] ss:$8 sps:$4 sm:$0xff]   ;;  %v1282_v59 = vld [vmem:[#allocation4 + $0xf0] ss:$8 sps:$4 sm:$0xff]   ;;  %v1285_v60 = vld [vmem:[#allocation4 + $0x104] ss:$8 sps:$4 sm:$0xff]  }
  0x4b   :  { %716 = vmatpush1.bf16.msra.mxu0 %v1246_v35  ;;  %v1485_v62 = vshrl.u32 %v99_v61, 7  ;;  %v1491_v1 = vld [vmem:[%s1541_s4] sm:$0xff]  ;;  %v1496_v2 = vld [vmem:[%s1541_s4 + $0x8] sm:$0xff]  ;;  %v1503_v34 = vld [vmem:[%s1541_s4 + $0x10] sm:$0xff]  ;;  %vm1038_vm1 = vcmask 7168  }
  0x4c   :  { %717 = vmatprep.subr.bf16.mxu0 %v1247_v36 }
  0x4d   :  { %250 = vmatpush1.bf16.msra.mxu1 %v1220_v12  ;;  %v101_v63 = vsub.s32 0, %v1485_v62  ;;  %v382_v61 = vsub.s32 1, %v1485_v62 }
  0x4e   :  { %251 = vmatprep.subr.bf16.mxu1 %v1221_v14 }
  0x4f   :  { %718 = vmatpush1.bf16.msra.mxu0 %v1249_v37  ;;  %v102_v3 = vrot.slane %v1491_v1, %v101_v63  ;;  %v106_v4 = vrot.slane %v1496_v2, %v101_v63 }
  0x50   :  { %719 = vmatprep.subr.bf16.mxu0 %v1250_v38 }
  0x51   :  { %252 = vmatpush1.bf16.msra.mxu1 %v1223_v16 }
  0x52   :  { %253 = vmatprep.subr.bf16.mxu1 %v1224_v17 }
  0x53   :  { %720 = vmatpush1.bf16.msra.mxu0 %v1252_v39  ;;  %v110_v39 = vrot.slane %v1503_v34, %v101_v63  ;;  %v1508_v63 = vsub.s32 2, %v1485_v62 }
  0x54   :  { %721 = vmatprep.subr.bf16.mxu0 %v1253_v40 }
  0x55   :  { %254 = vmatpush1.bf16.msra.mxu1 %v1226_v18 }
  0x56   :  { %1165 = vmatprep.subr.bf16.mxu1 %v1413_v22 }
  0x57   :  { %722 = vmatpush1.bf16.msra.mxu0 %v1255_v41 }
  0x58   :  { %272 = vmatmul.mubr.bf16.vlgmr.msra.gmra.mrb[0].mxu1 %v66_v21  ;;  %723 = vmatprep.subr.bf16.mxu0 %v1256_v42 }
  0x59   :  { %1166 = vmatpush3.bf16.msra.mxu1 %v1227_v20  ;;  %1181 = vmatprep.mubr.msk.bf16.mxu1 %vm1414_vm0, %v1413_v22 }
  0x5a   :  { %1167 = vmatprep.subr.bf16.mxu1 %v1413_v22 }
  0x5b   :  { %724 = vmatpush1.bf16.msra.mxu0 %v1258_v43 }
  0x5c   :  { %725 = vmatprep.subr.bf16.mxu0 %v1259_v44 }
  0x5d   :  { %1168 = vmatpush3.bf16.msra.mxu1 %v1228_v23 }
  0x5e   :  { %1169 = vmatprep.subr.bf16.mxu1 %v1413_v22 }
  0x5f   :  { %726 = vmatpush1.bf16.msra.mxu0 %v1261_v45 }
  0x60   :  { %727 = vmatprep.subr.bf16.mxu0 %v1262_v46 }
  0x61   :  { %1170 = vmatpush3.bf16.msra.mxu1 %v1229_v24 }
  0x62   :  { %1171 = vmatprep.subr.bf16.mxu1 %v1413_v22 }
  0x63   :  { %728 = vmatpush1.bf16.msra.mxu0 %v1264_v47 }
  0x64   :  { %729 = vmatprep.subr.bf16.mxu0 %v1265_v48 }
  0x65   :  { %1172 = vmatpush3.bf16.msra.mxu1 %v1230_v25 }
  0x66   :  { %1173 = vmatprep.subr.bf16.mxu1 %v1413_v22 }
  0x67   :  { %730 = vmatpush1.bf16.msra.mxu0 %v1267_v49 }
  0x68   :  { %731 = vmatprep.subr.bf16.mxu0 %v1268_v50 }
  0x69   :  { %1174 = vmatpush3.bf16.msra.mxu1 %v1231_v26 }
  0x6a   :  { %1175 = vmatprep.subr.bf16.mxu1 %v1413_v22 }
  0x6b   :  { %732 = vmatpush1.bf16.msra.mxu0 %v1270_v51 }
  0x6c   :  { %733 = vmatprep.subr.bf16.mxu0 %v1271_v52 }
  0x6d   :  { %1176 = vmatpush3.bf16.msra.mxu1 %v1232_v27 }
  0x6e   :  { %1177 = vmatprep.subr.bf16.mxu1 %v1413_v22 }
  0x6f   :  { %734 = vmatpush1.bf16.msra.mxu0 %v1273_v53 }
  0x70   :  { %735 = vmatprep.subr.bf16.mxu0 %v1274_v54 }
  0x71   :  { %1178 = vmatpush3.bf16.msra.mxu1 %v1233_v28 }
  0x72   :  { %1179 = vmatprep.subr.bf16.mxu1 %v1413_v22 }
  0x73   :  { %736 = vmatpush1.bf16.msra.mxu0 %v1276_v55 }
  0x74   :  { %737 = vmatprep.subr.bf16.mxu0 %v1277_v56 }
  0x75   :  { %1180 = vmatpush3.bf16.msra.mxu1 %v1234_v29 }
  0x77   :  { %738 = vmatpush1.bf16.msra.mxu0 %v1279_v57 }
  0x78   :  { %1182 = vmatmul.mubr.bf16.vlgmr.msra.gmra.mrb[4].mxu1 %v66_v21  ;;  %739 = vmatprep.subr.bf16.mxu0 %v1280_v58 }
  0x7b   :  { %740 = vmatpush1.bf16.msra.mxu0 %v1282_v59 }
  0x7c   :  { %750 = vmatprep.subr.bf16.mxu0 %v1285_v60 }
 0x12b   :  { %v273_v5 = vpop.f32.mrb[0].mxu1 }
 0x12c   :  { %v274_v6 = vadd.f32 %v273_v5, %v102_v3  ;;  %v275_v7 = vpop.f32.mrb[1].mxu1 }
 0x12d   :  { %v276_v8 = vadd.f32 %v275_v7, %v106_v4  ;;  %v277_v9 = vpop.f32.mrb[2].mxu1 }
 0x12e   :  { %v320_v10 = vmax.f32 %v274_v6, 0.0  ;;  %v278_v11 = vpop.f32.mrb[3].mxu1 }
 0x12f   :  { %v321_v12 = vmax.f32 %v276_v8, 0.0 }
 0x130   :  { %v323_v13 = vrot.slane %v320_v10, 4 }
 0x131   :  { %v329_v14 = vrot.slane %v321_v12, 4 }
 0x132   :  { %v324_v15 = vadd.f32 %v323_v13, %v320_v10  ;;  %v402_v13 = vrot.slane %v1496_v2, %v1508_v63 }
 0x133   :  { %v330_v16 = vadd.f32 %v329_v14, %v321_v12 }
 0x134   :  { %v325_v17 = vrot.slane %v324_v15, 2 }
 0x135   :  { %v331_v18 = vrot.slane %v330_v16, 2 }
 0x136   :  { %v326_v19 = vadd.f32 %v325_v17, %v324_v15 }
 0x137   :  { %v332_v20 = vadd.f32 %v331_v18, %v330_v16 }
 0x138   :  { %v327_v21 = vrot.slane %v326_v19, 1 }
 0x139   :  { %v333_v22 = vrot.slane %v332_v20, 1 }
 0x13a   :  { %v328_v23 = vadd.f32 %v327_v21, %v326_v19 }
 0x13b   :  { %v334_v24 = vadd.f32 %v333_v22, %v332_v20  ;;  %v1283_v22 = vld [vmem:[#allocation4 + $0x100] ss:$8 sps:$4 sm:$0xff]  }
 0x13c   :  { %v341_v25 = vmul.f32 0.125, %v328_v23 }
 0x13d   :  { %v342_v26 = vmul.f32 0.125, %v334_v24  ;;  %v1288_v24 = vld [vmem:[#allocation4 + $0x114] ss:$8 sps:$4 sm:$0xff]  }
 0x13e   :  { %v344_v27 = vsub.f32 %v320_v10, %v341_v25  ;;  %v398_v10 = vrot.slane %v1491_v1, %v1508_v63 }
 0x13f   :  { %v345_v28 = vsub.f32 %v321_v12, %v342_v26 }
 0x140   :  { %v347_v29 = vmul.f32 %v344_v27, %v344_v27 }
 0x141   :  { %v348_v30 = vmul.f32 %v345_v28, %v345_v28 }
 0x142   :  { %v350_v31 = vrot.slane %v347_v29, 4 }
 0x143   :  { %v356_v32 = vrot.slane %v348_v30, 4 }
 0x144   :  { %v351_v33 = vadd.f32 %v350_v31, %v347_v29  ;;  %v1286_v29 = vld [vmem:[#allocation4 + $0x110] ss:$8 sps:$4 sm:$0xff]   ;;  %v1289_v31 = vld [vmem:[#allocation4 + $0x120] ss:$8 sps:$4 sm:$0xff]  }
 0x145   :  { %v357_v35 = vadd.f32 %v356_v32, %v348_v30  ;;  %v1294_v32 = vld [vmem:[#allocation4 + $0x134] ss:$8 sps:$4 sm:$0xff]  }
 0x146   :  { %v352_v36 = vrot.slane %v351_v33, 2 }
 0x147   :  { %v358_v37 = vrot.slane %v357_v35, 2 }
 0x148   :  { %v353_v38 = vadd.f32 %v352_v36, %v351_v33  ;;  %v1297_v36 = vld [vmem:[#allocation4 + $0x144] ss:$8 sps:$4 sm:$0xff]  }
 0x149   :  { %v359_v40 = vadd.f32 %v358_v37, %v357_v35  ;;  %v1292_v35 = vld [vmem:[#allocation4 + $0x130] ss:$8 sps:$4 sm:$0xff]   ;;  %v1295_v37 = vld [vmem:[#allocation4 + $0x140] ss:$8 sps:$4 sm:$0xff]  }
 0x14a   :  { %v354_v41 = vrot.slane %v353_v38, 1 }
 0x14b   :  { %v314_v42 = vpop.f32.mrb[4].mxu1  ;;  %v360_v43 = vrot.slane %v359_v40, 1 }
 0x14c   :  { %v355_v44 = vadd.f32 %v354_v41, %v353_v38  ;;  %v315_v45 = vadd.f32 %v314_v42, %v110_v39  ;;  %v1183_v46 = vpop.f32.mrb[5].mxu1  ;;  %v1300_v38 = vld [vmem:[#allocation4 + $0x154] ss:$8 sps:$4 sm:$0xff]   ;;  %v1303_v39 = vld [vmem:[#allocation4 + $0x164] ss:$8 sps:$4 sm:$0xff]  }
 0x14d   :  { %v317_v47 = vpop.f32.mrb[6].mxu1  ;;  %v361_v48 = vadd.f32 %v360_v43, %v359_v40  ;;  %v1301_v42 = vld [vmem:[#allocation4 + $0x160] ss:$8 sps:$4 sm:$0xff]  }
 0x14e   :  { %v368_v49 = vmul.f32 0.125, %v355_v44  ;;  %v322_v50 = vmax.f32 %v315_v45, 0.0  ;;  %v1184_v51 = vpop.f32.mrb[7].mxu1  ;;  %v406_v44 = vrot.slane %v1503_v34, %v1508_v63  ;;  %v1306_v45 = vld [vmem:[#allocation4 + $0x174] ss:$8 sps:$4 sm:$0xff]  }
 0x14f   :  { %v369_v52 = vmul.f32 0.125, %v361_v48  ;;  %v1304_v47 = vld [vmem:[#allocation4 + $0x170] ss:$8 sps:$4 sm:$0xff]   ;;  %v1308_v51 = vld [vmem:[#allocation6] sm:$0xff]  }
 0x150   :  { %v371_v53 = vadd.f32 1e-05, %v368_v49  ;;  %v335_v54 = vrot.slane %v322_v50, 4  ;;  %v1320_v63 = vld [vmem:[#allocation6 + $0x30] sm:$0xff]  }
 0x151   :  { %v372_v55 = vadd.f32 1e-05, %v369_v52  ;;  %v1309_v52 = vld [vmem:[#allocation6 + $0x48] sm:$0xff]  }
 0x152   :  { %1323 = vrsqrt.f32 %v371_v53  ;;  %v336_v56 = vadd.f32 %v335_v54, %v322_v50  ;;  %v1310_v53 = vld [vmem:[#allocation6 + $0x8] sm:$0xff]   ;;  %v1311_v54 = vld [vmem:[#allocation6 + $0x50] sm:$0xff]  }
 0x153   :  { %1325 = vrsqrt.f32 %v372_v55  ;;  %v1313_v55 = vld [vmem:[#allocation6 + $0x58] sm:$0xff]  }
 0x154   :  { %v337_v57 = vrot.slane %v336_v56, 2 }
 0x156   :  { %v338_v58 = vadd.f32 %v337_v57, %v336_v56  ;;  %v1314_v56 = vld [vmem:[#allocation6 + $0x18] sm:$0xff]   ;;  %v1315_v57 = vld [vmem:[#allocation6 + $0x60] sm:$0xff]  }
 0x158   :  { %v339_v59 = vrot.slane %v338_v58, 1 }
 0x15a   :  { %v340_v60 = vadd.f32 %v339_v59, %v338_v58  ;;  %v1316_v58 = vld [vmem:[#allocation6 + $0x20] sm:$0xff]   ;;  %v1317_v59 = vld [vmem:[#allocation6 + $0x68] sm:$0xff]  }
 0x15c   :  { %v1324_v3 = vpop.eup %1323  ;;  %v343_v4 = vmul.f32 0.125, %v340_v60  ;;  %v1318_v60 = vld [vmem:[#allocation6 + $0x28] sm:$0xff]  }
 0x15d   :  { %v1326_v5 = vpop.eup %1325  ;;  %v377_v6 = vmul.f32 %v1324_v3, %v1491_v1  ;;  %v1321_v3 = vld [vmem:[#allocation6 + $0x78] sm:$0xff]  }
 0x15e   :  { %v346_v7 = vsub.f32 %v322_v50, %v343_v4  ;;  %v378_v8 = vmul.f32 %v1326_v5, %v1496_v2  ;;  %v1307_v50 = vld [vmem:[#allocation6 + $0x40] sm:$0xff]   ;;  %v1322_v4 = vld [vmem:[#allocation6 + $0x38] sm:$0xff]   ;;  %v463_v5 = vsub.s32 3, %v1485_v62 }
 0x15f   :  { %v383_v9 = vrot.slane %v377_v6, %v382_v61  ;;  %1143 = vmatprep.subr.bf16.mxu1 %v1307_v50  ;;  %v833_v50 = vsub.s32 4, %v1485_v62 }
 0x160   :  { %v349_v11 = vmul.f32 %v346_v7, %v346_v7  ;;  %v387_v12 = vrot.slane %v378_v8, %v382_v61  ;;  %1144 = vmatpush3.bf16.msra.mxu1 %v1308_v51  ;;  %v464_v6 = vrot.slane %v1491_v1, %v463_v5  ;;  %v843_v51 = vsub.s32 5, %v1485_v62 }
 0x161   :  { %v392_v14 = vmul.f32 %v383_v9, %v344_v27  ;;  %v1291_v27 = vld [vmem:[#allocation4 + $0x124] ss:$8 sps:$4 sm:$0xff]   ;;  %1145 = vmatprep.subr.bf16.mxu1 %v1309_v52 }
 0x162   :  { %v362_v15 = vrot.slane %v349_v11, 4  ;;  %v393_v16 = vmul.f32 %v387_v12, %v345_v28 }
 0x163   :  { %v407_v17 = vadd.f32 %v398_v10, %v392_v14 }
 0x164   :  { %v363_v18 = vadd.f32 %v362_v15, %v349_v11  ;;  %v408_v19 = vadd.f32 %v402_v13, %v393_v16  ;;  %1146 = vmatpush3.bf16.msra.mxu1 %v1310_v53 }
 0x165   :  { %v410_v23 = vpack.c.bf16 %v407_v17, %v407_v17  ;;  %1147 = vmatprep.subr.bf16.mxu1 %v1311_v54 }
 0x166   :  { %v364_v20 = vrot.slane %v363_v18, 2  ;;  %v411_v21 = vpack.c.bf16 %v408_v19, %v408_v19 }
 0x168   :  { %v365_v25 = vadd.f32 %v364_v20, %v363_v18  ;;  %741 = vmatprep.mubr.bf16.mxu0 %v411_v21 }
 0x169   :  { %742 = vmatmul.mubr.bf16.vlgmr.msra.gmra.mrb[0].mxu0 %v410_v23 }
 0x16a   :  { %v366_v26 = vrot.slane %v365_v25, 1  ;;  %751 = vmatpush1.bf16.msra.mxu0 %v1283_v22  ;;  %782 = vmatprep.mubr.bf16.mxu0 %v1412_v0  ;;  %v1298_v0 = vld [vmem:[#allocation4 + $0x150] ss:$8 sps:$4 sm:$0xff]  }
 0x16b   :  { %752 = vmatprep.subr.bf16.mxu0 %v1288_v24 }
 0x16c   :  { %v367_v30 = vadd.f32 %v366_v26, %v365_v25 }
 0x16e   :  { %v370_v28 = vmul.f32 0.125, %v367_v30  ;;  %753 = vmatpush1.bf16.msra.mxu0 %v1286_v29 }
 0x16f   :  { %754 = vmatprep.subr.bf16.mxu0 %v1291_v27 }
 0x170   :  { %v373_v33 = vadd.f32 1e-05, %v370_v28 }
 0x172   :  { %1327 = vrsqrt.f32 %v373_v33  ;;  %755 = vmatpush1.bf16.msra.mxu0 %v1289_v31 }
 0x173   :  { %756 = vmatprep.subr.bf16.mxu0 %v1294_v32 }
 0x176   :  { %757 = vmatpush1.bf16.msra.mxu0 %v1292_v35 }
 0x177   :  { %758 = vmatprep.subr.bf16.mxu0 %v1297_v36 }
 0x17a   :  { %759 = vmatpush1.bf16.msra.mxu0 %v1295_v37 }
 0x17b   :  { %760 = vmatprep.subr.bf16.mxu0 %v1300_v38 }
 0x17c   :  { %v1328_v40 = vpop.eup %1327 }
 0x17d   :  { %v379_v41 = vmul.f32 %v1328_v40, %v1503_v34  ;;  %v1312_v34 = vld [vmem:[#allocation6 + $0x10] sm:$0xff]  }
 0x17e   :  { %761 = vmatpush1.bf16.msra.mxu0 %v1298_v0  ;;  %1148 = vmatpush3.bf16.msra.mxu1 %v1312_v34 }
 0x17f   :  { %v391_v43 = vrot.slane %v379_v41, %v382_v61  ;;  %762 = vmatprep.subr.bf16.mxu0 %v1303_v39  ;;  %1149 = vmatprep.subr.bf16.mxu1 %v1313_v55  ;;  %v1319_v61 = vld [vmem:[#allocation6 + $0x70] sm:$0xff]  }
 0x181   :  { %v394_v46 = vmul.f32 %v391_v43, %v346_v7  ;;  %v468_v7 = vrot.slane %v1496_v2, %v463_v5  ;;  %v887_v5 = vsub.s32 6, %v1485_v62 }
 0x182   :  { %763 = vmatpush1.bf16.msra.mxu0 %v1301_v42  ;;  %1150 = vmatpush3.bf16.msra.mxu1 %v1314_v56  ;;  %v844_v56 = vrot.slane %v1491_v1, %v843_v51 }
 0x183   :  { %764 = vmatprep.subr.bf16.mxu0 %v1306_v45  ;;  %v409_v48 = vadd.f32 %v406_v44, %v394_v46  ;;  %1151 = vmatprep.subr.bf16.mxu1 %v1315_v57 }
 0x185   :  { %v412_v49 = vpack.c.bf16 %v409_v48, %v409_v48 }
 0x186   :  { %765 = vmatpush1.bf16.msra.mxu0 %v1304_v47  ;;  %1152 = vmatpush3.bf16.msra.mxu1 %v1316_v58  ;;  %v848_v58 = vrot.slane %v1496_v2, %v843_v51 }
 0x187   :  { %1153 = vmatprep.subr.bf16.mxu1 %v1317_v59 }
 0x189   :  { %783 = vmatmul.mubr.bf16.vlgmr.msra.gmra.mrb[0].mxu0 %v412_v49 }
 0x18a   :  { %1154 = vmatpush3.bf16.msra.mxu1 %v1318_v60 }
 0x18b   :  { %1155 = vmatprep.subr.bf16.mxu1 %v1319_v61 }
 0x18e   :  { %1156 = vmatpush3.bf16.msra.mxu1 %v1320_v63 }
 0x18f   :  { %1157 = vmatprep.subr.bf16.mxu1 %v1321_v3 }
 0x192   :  { %1158 = vmatpush3.bf16.msra.mxu1 %v1322_v4 }
 0x25c   :  { %v784_v8 = vpop.f32.mrb[0].mxu0 }
 0x25d   :  { %v1185_v9 = vadd.f32 %v784_v8, %v464_v6  ;;  %v786_v10 = vpop.f32.mrb[1].mxu0  ;;  %v1028_v8 = vsub.s32 7, %v1485_v62 }
 0x25e   :  { %v1186_v11 = vadd.f32 %v786_v10, %v468_v7  ;;  %v788_v12 = vpop.f32.mrb[2].mxu0  ;;  %v888_v7 = vrot.slane %v1491_v1, %v887_v5 }
 0x25f   :  { %v791_v13 = vmax.f32 %v1185_v9, 0.0  ;;  %v789_v14 = vpop.f32.mrb[3].mxu0 }
 0x260   :  { %v792_v15 = vmax.f32 %v1186_v11, 0.0  ;;  %v1029_v14 = vrot.slane %v1491_v1, %v1028_v8 }
 0x261   :  { %v793_v16 = vrot.slane %v791_v13, 4 }
 0x262   :  { %v799_v17 = vrot.slane %v792_v15, 4 }
 0x263   :  { %v794_v18 = vadd.f32 %v793_v16, %v791_v13 }
 0x264   :  { %v800_v19 = vadd.f32 %v799_v17, %v792_v15  ;;  %v1036_v17 = vrot.slane %v1496_v2, %v887_v5 }
 0x265   :  { %v795_v20 = vrot.slane %v794_v18, 2 }
 0x266   :  { %v801_v21 = vrot.slane %v800_v19, 2 }
 0x267   :  { %v796_v22 = vadd.f32 %v795_v20, %v794_v18 }
 0x268   :  { %v802_v23 = vadd.f32 %v801_v21, %v800_v19 }
 0x269   :  { %v797_v24 = vrot.slane %v796_v22, 1 }
 0x26a   :  { %v803_v25 = vrot.slane %v802_v23, 1 }
 0x26b   :  { %v798_v26 = vadd.f32 %v797_v24, %v796_v22 }
 0x26c   :  { %v804_v29 = vadd.f32 %v803_v25, %v802_v23 }
 0x26d   :  { %v805_v27 = vmul.f32 0.125, %v798_v26 }
 0x26e   :  { %v806_v30 = vmul.f32 0.125, %v804_v29 }
 0x26f   :  { %v807_v28 = vsub.f32 %v791_v13, %v805_v27 }
 0x270   :  { %v808_v31 = vsub.f32 %v792_v15, %v806_v30 }
 0x271   :  { %v809_v32 = vmul.f32 %v807_v28, %v807_v28 }
 0x272   :  { %v810_v33 = vmul.f32 %v808_v31, %v808_v31 }
 0x273   :  { %v811_v35 = vrot.slane %v809_v32, 4 }
 0x274   :  { %v817_v36 = vrot.slane %v810_v33, 4 }
 0x275   :  { %v812_v37 = vadd.f32 %v811_v35, %v809_v32 }
 0x276   :  { %v818_v38 = vadd.f32 %v817_v36, %v810_v33 }
 0x277   :  { %v813_v0 = vrot.slane %v812_v37, 2 }
 0x278   :  { %v819_v39 = vrot.slane %v818_v38, 2 }
 0x279   :  { %v814_v40 = vadd.f32 %v813_v0, %v812_v37 }
 0x27a   :  { %v820_v41 = vadd.f32 %v819_v39, %v818_v38 }
 0x27b   :  { %v815_v42 = vrot.slane %v814_v40, 1 }
 0x27c   :  { %v821_v43 = vrot.slane %v820_v41, 1 }
 0x27d   :  { %v816_v44 = vadd.f32 %v815_v42, %v814_v40 }
 0x27e   :  { %v822_v45 = vadd.f32 %v821_v43, %v820_v41 }
 0x27f   :  { %v823_v46 = vmul.f32 0.125, %v816_v44 }
 0x280   :  { %v824_v47 = vmul.f32 0.125, %v822_v45 }
 0x281   :  { %v825_v48 = vadd.f32 1e-05, %v823_v46 }
 0x282   :  { %v826_v49 = vadd.f32 1e-05, %v824_v47 }
 0x283   :  { %1329 = vrsqrt.f32 %v825_v48 }
 0x284   :  { %1331 = vrsqrt.f32 %v826_v49 }
 0x28d   :  { %v1330_v52 = vpop.eup %1329 }
 0x28e   :  { %v1332_v53 = vpop.eup %1331  ;;  %v829_v54 = vmul.f32 %v1330_v52, %v1491_v1 }
 0x28f   :  { %v830_v34 = vmul.f32 %v1332_v53, %v1496_v2 }
 0x290   :  { %v834_v55 = vrot.slane %v829_v54, %v833_v50 }
 0x291   :  { %v838_v57 = vrot.slane %v830_v34, %v833_v50 }
 0x292   :  { %v839_v59 = vmul.f32 %v834_v55, %v807_v28 }
 0x293   :  { %v840_v60 = vmul.f32 %v838_v57, %v808_v31 }
 0x294   :  { %v849_v61 = vadd.f32 %v844_v56, %v839_v59 }
 0x295   :  { %v850_v63 = vadd.f32 %v848_v58, %v840_v60 }
 0x296   :  { %v851_v4 = vpack.c.bf16 %v849_v61, %v849_v61 }
 0x297   :  { %v852_v3 = vpack.c.bf16 %v850_v63, %v850_v63 }
 0x299   :  { %1017 = vmatprep.mubr.bf16.mxu1 %v852_v3 }
 0x29a   :  { %1018 = vmatmul.mubr.bf16.vlgmr.msra.gmra.mrb[8].mxu1 %v851_v4 }
 0x36d   :  { %v1159_v6 = vpop.f32.mrb[8].mxu1 }
 0x36e   :  { %v1160_v9 = vpop.f32.mrb[9].mxu1 }
 0x36f   :  { %v1161_v10 = vadd.f32 %v1160_v9, %v1159_v6  ;;  %v1162_v11 = vpop.f32.mrb[10].mxu1 }
 0x370   :  { %v1163_v12 = vpop.f32.mrb[11].mxu1 }
 0x371   :  { %v1020_v13 = vadd.f32 %v1161_v10, %v888_v7 }
 0x373   :  { %v1025_v15 = vmax.f32 %v1020_v13, 0.0 }
 0x375   :  { %v1030_v16 = vmul.f32 %v1029_v14, %v1025_v15 }
 0x377   :  { %1031 = vadd.xlane.f32.xlu0 %v1030_v16 }
 0x404   :  { %v1032_v18 = vpop.xlane.xlu0 %1031 }
 0x405   :  { %v1037_v19 = vadd.f32 %v1036_v17, %v1032_v18 }
 0x407   :  { %1039 = vst.msk [vmem:[%s1542_s5] sm:$0xff] %vm1038_vm1, %v1037_v19 }
 0x408   :  { %1044 = vsyncpa [#allocation3], 1 }
 0x409   :  { %1045 = vsyncpa [#allocation5], 1 }

</bundles_post_ra>
